<compile_context>
chip_gen: v5e
topology: v5e:2x2
jax: 0.10.0
libtpu: 0.0.40
codegen_flags: <defaults>
</compile_context>

<pallas_src>
import jax
import jax.numpy as jnp
from jax import lax
from jax.experimental import pallas as pl
from jax.experimental.pallas import tpu as pltpu


# Attention tile: per-k-step work must amortize the ~0.35us grid-step
# overhead; 1024x1024 f32 score/prob temps (~4 MiB each) fit scoped VMEM on
# v5e/v6e (128 MiB) and v7x (64 MiB).
_MAX_TILE = 1024
# Projection tiles are decoupled and much larger (pure streaming work).
_MAX_PROJ_LANES = 4096


def _round_up(x, m):
    return (x + m - 1) // m * m


def _pick_tile(hw, max_tile=_MAX_TILE):
    """Return (tile, padded_extent) for a spatial dim of size hw."""
    if hw <= max_tile:
        return hw, hw
    return max_tile, pl.cdiv(hw, max_tile) * max_tile


def _proj_tile(hw_padded, t_base, max_lanes=_MAX_PROJ_LANES):
    """Largest multiple of t_base that divides hw_padded and is <= max_lanes."""
    n = hw_padded // t_base
    for k in range(n, 0, -1):
        if n % k == 0 and t_base * k <= max_lanes:
            return t_base * k
    return t_base


def _full_spec(shape):
    nd = len(shape)
    return pl.BlockSpec(shape, lambda *_, nd=nd: (0,) * nd)


def _vmem_capacity_bytes():
    try:
        return int(pltpu.get_tpu_info().vmem_capacity_bytes)
    except Exception:
        return 64 << 20          # conservative (v7x per-TensorCore capacity)


def _vmem_limit_bytes(est_bytes):
    cap = _vmem_capacity_bytes()
    hi = cap - (12 << 20)        # leave headroom for the compiler
    return int(min(hi, max(32 << 20, 2 * est_bytes)))


# ----------------------------------------------------------------------------
# Shared compute helper (channels-first; 1x1 conv == matmul over channels)
# ----------------------------------------------------------------------------
def _basic_conv(x, w_ref, t_ref):
    # folded BasicConv: y = relu(w' @ x + t), f32 accumulation on the MXU.
    y = jnp.dot(w_ref[...], x, preferred_element_type=jnp.float32)
    return jnp.maximum(y + t_ref[...], 0.0)


# ----------------------------------------------------------------------------
# Stage 1: key / value projection (K emitted spatial-major)
# ----------------------------------------------------------------------------
def _kv_proj_kernel(x_ref, wk1_ref, tk1_ref, wk2_ref, tk2_ref,
                    wv_ref, bv_ref, k_ref, v_ref):
    x = x_ref[0]                                            # [Ck_p, TKP] bf16
    y = _basic_conv(x, wk1_ref, tk1_ref).astype(x.dtype)
    k_cf = _basic_conv(y, wk2_ref, tk2_ref)                 # [Ckq, TKP]  f32
    # Store K spatial-major: one in-kernel transpose replaces the wrapper-side
    # XLA swapaxes (which re-read and re-wrote all of K in HBM).
    k_ref[0] = k_cf.T.astype(k_ref.dtype)                   # [TKP, Ckq]
    # fused value projection: single matmul + bias, no norm / activation
    v = jnp.dot(wv_ref[...], x, preferred_element_type=jnp.float32) + bv_ref[...]
    v_ref[0] = v.astype(v_ref.dtype)


# ----------------------------------------------------------------------------
# Stage 2: fused Q-projection + flash attention + out-projection
# ----------------------------------------------------------------------------
def _make_attn_kernel(hwk_valid, tk, mask_keys):
    def kernel(x_ref, wq1_ref, tq1_ref, wq2_ref, tq2_ref,
               k_ref, v_ref, wo_ref, to_ref, out_ref,
               q_sc, m_sc, l_sc, acc_sc):
        ki = pl.program_id(2)

        @pl.when(ki == 0)
        def _():
            # Fused Q projection: runs once per (batch, q-tile); the 1/sqrt(d)
            # scale is already folded into wq2 / tq2.
            x = x_ref[0]                                    # [Cq_p, TQ] bf16
            y = _basic_conv(x, wq1_ref, tq1_ref).astype(x.dtype)
            q_sc[...] = _basic_conv(y, wq2_ref, tq2_ref).astype(q_sc.dtype)
            m_sc[...] = jnp.full(m_sc.shape, -jnp.inf, jnp.float32)
            l_sc[...] = jnp.zeros(l_sc.shape, jnp.float32)
            acc_sc[...] = jnp.zeros(acc_sc.shape, jnp.float32)

        q = q_sc[...]                                       # [Ckq, TQ]  bf16
        k = k_ref[0]                                        # [TK, Ckq]  bf16
        v = v_ref[0]                                        # [Cout, TK] bf16

        # transposed score tile s[TK, TQ] = K_sm @ Q (plain NN contraction)
        s = jnp.dot(k, q, preferred_element_type=jnp.float32)
        if mask_keys:
            # Only traced when spatial padding exists; compare/select is a
            # [TK, 1] column, the full-tile cost is a single broadcast add.
            kpos = ki * tk + lax.broadcasted_iota(jnp.int32, (tk, 1), 0)
            s = s + jnp.where(kpos < hwk_valid, 0.0, -1e30)

        m_prev = m_sc[...]                                  # [1, TQ]
        m_new = jnp.maximum(m_prev, jnp.max(s, axis=0, keepdims=True))
        alpha = jnp.exp(m_prev - m_new)                     # [1, TQ]
        p = jnp.exp(s - m_new)                              # [TK, TQ]
        l_sc[...] = alpha * l_sc[...] + jnp.sum(p, axis=0, keepdims=True)
        acc_sc[...] = alpha * acc_sc[...] + jnp.dot(
            v, p.astype(v.dtype), preferred_element_type=jnp.float32)
        m_sc[...] = m_new

        @pl.when(ki == pl.num_programs(2) - 1)
        def _():
            # exact normalization (runs once per q tile -> approx buys nothing)
            ctx = acc_sc[...] / l_sc[...]
            # out_project: BasicConv (folded) -> relu(wo' @ ctx + to)
            y = jnp.dot(wo_ref[...], ctx.astype(wo_ref.dtype),
                        preferred_element_type=jnp.float32)
            out_ref[0] = jnp.maximum(y + to_ref[...], 0.0).astype(out_ref.dtype)

    return kernel


# ----------------------------------------------------------------------------
# Parameter folding (wrapper-time algebra, semantics preserved)
# ----------------------------------------------------------------------------
def _fold_params(params, scale_q=1.0, compute_dtype=jnp.bfloat16):
    def conv_w(w, s=None, scale=1.0):
        w = w if s is None else w * s            # fold BN scale into weights
        if scale != 1.0:
            w = w * scale                        # fold attention 1/sqrt(d)
        return jnp.asarray(w.T, compute_dtype)   # [Cout, Cin] channels-first

    def shift(t, scale=1.0):
        return jnp.asarray(jnp.reshape(t, (-1, 1)) * scale, jnp.float32)

    # fuse the two bias-only value convs (no nonlinearity between them)
    wv = params["wv1"] @ params["wv2"]
    bv = params["bv1"] @ params["wv2"] + params["bv2"]

    return dict(
        wq1=conv_w(params["wq1"], params["sq1"]), tq1=shift(params["tq1"]),
        wq2=conv_w(params["wq2"], params["sq2"], scale_q),
        tq2=shift(params["tq2"], scale_q),
        wk1=conv_w(params["wk1"], params["sk1"]), tk1=shift(params["tk1"]),
        wk2=conv_w(params["wk2"], params["sk2"]), tk2=shift(params["tk2"]),
        wv=conv_w(wv), bv=shift(bv),
        wo=conv_w(params["wo"], params["so"]), to=shift(params["to"]),
    )


def _pad_last(a, n):
    pad = n - a.shape[-1]
    return a if pad == 0 else jnp.pad(a, ((0, 0), (0, pad)))


def _pad_cx(x, c_to, hw_to):
    _, c, hw = x.shape
    if c == c_to and hw == hw_to:
        return x
    return jnp.pad(x, ((0, 0), (0, c_to - c), (0, hw_to - hw)))


# ----------------------------------------------------------------------------
# Wrapper (NCHW in / NCHW out)
# ----------------------------------------------------------------------------
def self_attention_block(query_x, key_x, params, key_query_out_channel,
                         matmul_norm=True, compute_dtype=jnp.bfloat16):
    B, Cq, Hq, Wq = query_x.shape
    Bk, Ck, Hk, Wk = key_x.shape
    assert Bk == B
    HWq, HWk = Hq * Wq, Hk * Wk
    Ckq = params["wq2"].shape[1]
    Cout = params["wo"].shape[1]

    scale_q = float(key_query_out_channel) ** -0.5 if matmul_norm else 1.0
    f = _fold_params(params, scale_q, compute_dtype)

    # bf16 sublane packing: round input channel dims up to a multiple of 16
    # (zero-padded channels with zero weight columns are exact).
    Cq_p, Ck_p = _round_up(Cq, 16), _round_up(Ck, 16)
    f["wq1"] = _pad_last(f["wq1"], Cq_p)
    f["wk1"] = _pad_last(f["wk1"], Ck_p)
    f["wv"] = _pad_last(f["wv"], Ck_p)

    # NCHW -> channels-first flattened spatial (pure reshape, no transpose)
    qx = query_x.reshape(B, Cq, HWq)
    kx = key_x.reshape(B, Ck, HWk)

    TQ, HWq_p = _pick_tile(HWq)
    TK, HWk_p = _pick_tile(HWk)
    # v7x megacore: make sure the parallel grid axes give >= 2 iterations.
    if B * (HWq_p // TQ) < 2 and TQ % 256 == 0:
        TQ //= 2

    qx = _pad_cx(qx, Cq_p, HWq_p).astype(compute_dtype)
    kx = _pad_cx(kx, Ck_p, HWk_p).astype(compute_dtype)
    nQT, nKT = HWq_p // TQ, HWk_p // TK

    # ---------------- stage 1: key / value projection ------------------------
    TKP = _proj_tile(HWk_p, TK)                        # large decoupled tile
    kv_est = (2 * 2 * (Ck_p * TKP + TKP * max(Ckq, 128) + Cout * TKP)
              + 4 * TKP * (2 * Ckq + Cout + max(Ckq, 128))
              + 2 * (Ckq * (Ck_p + Ckq) + Cout * Ck_p) + 4 * (2 * Ckq + Cout))

    k_sm, v = pl.pallas_call(
        _kv_proj_kernel,
        out_shape=(
            jax.ShapeDtypeStruct((B, HWk_p, Ckq), compute_dtype),    # K (spatial-major)
            jax.ShapeDtypeStruct((B, Cout, HWk_p), compute_dtype),   # V (channels-first)
        ),
        grid_spec=pltpu.PrefetchScalarGridSpec(
            num_scalar_prefetch=0,
            grid=(B, HWk_p // TKP),
            in_specs=[
                pl.BlockSpec((1, Ck_p, TKP), lambda b, r: (b, 0, r)),
                _full_spec(f["wk1"].shape), _full_spec(f["tk1"].shape),
                _full_spec(f["wk2"].shape), _full_spec(f["tk2"].shape),
                _full_spec(f["wv"].shape), _full_spec(f["bv"].shape),
            ],
            out_specs=(
                pl.BlockSpec((1, TKP, Ckq), lambda b, r: (b, r, 0)),
                pl.BlockSpec((1, Cout, TKP), lambda b, r: (b, 0, r)),
            ),
        ),
        compiler_params=pltpu.CompilerParams(
            dimension_semantics=("parallel", "parallel"),
            vmem_limit_bytes=_vmem_limit_bytes(kv_est)),
    )(kx, f["wk1"], f["tk1"], f["wk2"], f["tk2"], f["wv"], f["bv"])

    # ---------------- stage 2: fused Q-proj + flash attention + out-proj -----
    mask_keys = HWk_p != HWk
    attn_kernel = _make_attn_kernel(HWk, TK, mask_keys)

    flops = int(2 * B * HWq_p * (HWk_p * (Ckq + Cout)
                                 + Ckq * (Cq_p + Ckq) + Cout * Cout))
    transcendentals = int(B * HWq_p * (HWk_p + nKT))
    bytes_accessed = int(2 * B * Cq_p * HWq_p
                         + nQT * 2 * B * HWk_p * (Ckq + Cout)
                         + 4 * B * Cout * HWq_p
                         + 2 * (f["wq1"].size + f["wq2"].size + f["wo"].size)
                         + 4 * (f["tq1"].size + f["tq2"].size + f["to"].size))

    attn_est = (2 * 2 * (Cq_p * TQ + TK * max(Ckq, 128) + Cout * TK)
                + 2 * 4 * Cout * TQ
                + 2 * (Ckq * (Cq_p + Ckq) + Cout * Cout) + 4 * (2 * Ckq + Cout)
                + 2 * Ckq * TQ + 4 * (2 * 8 * TQ + Cout * TQ)
                + 4 * 4 * TK * TQ)

    out = pl.pallas_call(
        attn_kernel,
        out_shape=jax.ShapeDtypeStruct((B, Cout, HWq_p), jnp.float32),
        grid_spec=pltpu.PrefetchScalarGridSpec(
            num_scalar_prefetch=0,
            grid=(B, nQT, nKT),
            in_specs=[
                pl.BlockSpec((1, Cq_p, TQ), lambda b, qi, ki: (b, 0, qi)),
                _full_spec(f["wq1"].shape), _full_spec(f["tq1"].shape),
                _full_spec(f["wq2"].shape), _full_spec(f["tq2"].shape),
                pl.BlockSpec((1, TK, Ckq), lambda b, qi, ki: (b, ki, 0)),
                pl.BlockSpec((1, Cout, TK), lambda b, qi, ki: (b, 0, ki)),
                _full_spec(f["wo"].shape), _full_spec(f["to"].shape),
            ],
            out_specs=pl.BlockSpec((1, Cout, TQ), lambda b, qi, ki: (b, 0, qi)),
            scratch_shapes=[
                pltpu.VMEM((Ckq, TQ), compute_dtype),  # projected Q tile
                pltpu.VMEM((1, TQ), jnp.float32),      # running max
                pltpu.VMEM((1, TQ), jnp.float32),      # running sum
                pltpu.VMEM((Cout, TQ), jnp.float32),   # f32 accumulator
            ],
        ),
        compiler_params=pltpu.CompilerParams(
            dimension_semantics=("parallel", "parallel", "arbitrary"),
            vmem_limit_bytes=_vmem_limit_bytes(attn_est)),
        cost_estimate=pl.CostEstimate(
            flops=flops, transcendentals=transcendentals,
            bytes_accessed=bytes_accessed),
    )(qx, f["wq1"], f["tq1"], f["wq2"], f["tq2"], k_sm, v, f["wo"], f["to"])

    # [B, Cout, HWq_p] -> NCHW (drop spatial padding; no transpose needed)
    out = out[:, :, :HWq]
    return out.reshape(B, Cout, Hq, Wq)


# ----------------------------------------------------------------------------
# Deterministic parameter init (synthetic; BN expressed as eval-mode stats)
# ----------------------------------------------------------------------------
def _fold_bn(key, c, eps=1e-5):
    k1, k2, k3, k4 = jax.random.split(key, 4)
    gamma = 1.0 + 0.1 * jax.random.normal(k1, (1, c), jnp.float32)
    beta = 0.1 * jax.random.normal(k2, (1, c), jnp.float32)
    mean = 0.1 * jax.random.normal(k3, (1, c), jnp.float32)
    var = jnp.abs(jax.random.normal(k4, (1, c), jnp.float32)) + 0.5
    s = gamma / jnp.sqrt(var + eps)
    t = beta - mean * s
    return s, t


def make_params(key_in, query_in, kq_out, out_ch, seed=0):
    keys = jax.random.split(jax.random.PRNGKey(seed), 16)

    def w(k, cin, cout):
        return 0.2 * jax.random.normal(k, (cin, cout), jnp.float32)

    p = {}
    # query_project: BasicConv(query_in -> kq_out), BasicConv(kq_out -> kq_out)
    p["wq1"] = w(keys[0], query_in, kq_out); p["sq1"], p["tq1"] = _fold_bn(keys[1], kq_out)
    p["wq2"] = w(keys[2], kq_out, kq_out);   p["sq2"], p["tq2"] = _fold_bn(keys[3], kq_out)
    # key_project: BasicConv(key_in -> kq_out), BasicConv(kq_out -> kq_out)
    p["wk1"] = w(keys[4], key_in, kq_out);   p["sk1"], p["tk1"] = _fold_bn(keys[5], kq_out)
    p["wk2"] = w(keys[6], kq_out, kq_out);   p["sk2"], p["tk2"] = _fold_bn(keys[7], kq_out)
    # value_project: plain Conv2d(key_in -> out_ch), Conv2d(out_ch -> out_ch)
    p["wv1"] = w(keys[8], key_in, out_ch)
    p["bv1"] = 0.1 * jax.random.normal(keys[9], (1, out_ch), jnp.float32)
    p["wv2"] = w(keys[10], out_ch, out_ch)
    p["bv2"] = 0.1 * jax.random.normal(keys[11], (1, out_ch), jnp.float32)
    # out_project: single BasicConv(out_ch -> out_ch)
    p["wo"] = w(keys[12], out_ch, out_ch);   p["so"], p["to"] = _fold_bn(keys[13], out_ch)
    return p


# ----------------------------------------------------------------------------
# Pure-JAX f32 reference for validation
# ----------------------------------------------------------------------------
def reference(query_x, key_x, p, kq_out, matmul_norm=True):
    B, Cq, Hq, Wq = query_x.shape
    _, Ck, Hk, Wk = key_x.shape
    qx = jnp.transpose(query_x.reshape(B, Cq, -1), (0, 2, 1))
    kx = jnp.transpose(key_x.reshape(B, Ck, -1), (0, 2, 1))

    def basic(x, w, s, t):
        return jnp.maximum(x @ w * s + t, 0.0)

    q = basic(basic(qx, p["wq1"], p["sq1"], p["tq1"]), p["wq2"], p["sq2"], p["tq2"])
    k = basic(basic(kx, p["wk1"], p["sk1"], p["tk1"]), p["wk2"], p["sk2"], p["tk2"])
    v = (kx @ p["wv1"] + p["bv1"]) @ p["wv2"] + p["bv2"]
    sim = jnp.einsum("bqc,bkc->bqk", q, k)
    if matmul_norm:
        sim = sim * kq_out ** (-0.5)
    sim = jax.nn.softmax(sim, axis=-1)
    ctx = jnp.einsum("bqk,bkc->bqc", sim, v)
    out = basic(ctx, p["wo"], p["so"], p["to"])
    Cout = p["wo"].shape[1]
    return jnp.transpose(out, (0, 2, 1)).reshape(B, Cout, Hq, Wq)


# ----------------------------------------------------------------------------
if __name__ == "__main__":
    B = 2
    key_in_channel = 8
    query_in_channel = 8
    key_query_out_channel = 16
    out_channel = 16
    Hq = Wq = 8     # query spatial -> HWq = 64
    Hk = Wk = 8     # key spatial   -> HWk = 64

    root = jax.random.PRNGKey(0)
    kq, kk = jax.random.split(root)
    query_x = jax.random.normal(kq, (B, query_in_channel, Hq, Wq), jnp.float32)
    key_x = jax.random.normal(kk, (B, key_in_channel, Hk, Wk), jnp.float32)

    params = make_params(key_in_channel, query_in_channel,
                         key_query_out_channel, out_channel, seed=0)

    out = self_attention_block(query_x, key_x, params, key_query_out_channel)
    out = jax.block_until_ready(out)

    ref = reference(query_x, key_x, params, key_query_out_channel)
    assert out.shape == (B, out_channel, Hq, Wq)
    # bf16 MXU operands vs f32 reference (exact softmax normalization now)
    assert jnp.allclose(out, ref, atol=3e-2, rtol=3e-2), \
        f"max err {jnp.max(jnp.abs(out - ref))}"

    print("KERNEL_OK")
</pallas_src>

<mosaic_0001>
module attributes {stable_mosaic.version = 11 : i64} {
  func.func @_kv_proj_kernel(%arg0: i32, %arg1: i32, %arg2: memref<1x16x64xbf16, #tpu.memory_space<vmem>>, %arg3: memref<16x16xbf16, #tpu.memory_space<vmem>>, %arg4: memref<16x1xf32, #tpu.memory_space<vmem>>, %arg5: memref<16x16xbf16, #tpu.memory_space<vmem>>, %arg6: memref<16x1xf32, #tpu.memory_space<vmem>>, %arg7: memref<16x16xbf16, #tpu.memory_space<vmem>>, %arg8: memref<16x1xf32, #tpu.memory_space<vmem>>, %arg9: memref<1x64x16xbf16, #tpu.memory_space<vmem>>, %arg10: memref<1x16x64xbf16, #tpu.memory_space<vmem>>) attributes {dimension_semantics = [#tpu.dimension_semantics<parallel>, #tpu.dimension_semantics<parallel>], iteration_bounds = array<i64: 2, 1>, scalar_prefetch = 0 : i64, scratch_operands = 0 : i64, tpu.core_type = #tpu.core_type<tc>, window_params = [{transform_indices = @transform_0, window_bounds = array<i64: 1, 16, 64>}, {pipeline_mode = #tpu.pipeline_mode<synchronous>, transform_indices = @transform_1, window_bounds = array<i64: 16, 16>}, {pipeline_mode = #tpu.pipeline_mode<synchronous>, transform_indices = @transform_2, window_bounds = array<i64: 16, 1>}, {pipeline_mode = #tpu.pipeline_mode<synchronous>, transform_indices = @transform_3, window_bounds = array<i64: 16, 16>}, {pipeline_mode = #tpu.pipeline_mode<synchronous>, transform_indices = @transform_4, window_bounds = array<i64: 16, 1>}, {pipeline_mode = #tpu.pipeline_mode<synchronous>, transform_indices = @transform_5, window_bounds = array<i64: 16, 16>}, {pipeline_mode = #tpu.pipeline_mode<synchronous>, transform_indices = @transform_6, window_bounds = array<i64: 16, 1>}, {transform_indices = @transform_7, window_bounds = array<i64: 1, 64, 16>}, {transform_indices = @transform_8, window_bounds = array<i64: 1, 16, 64>}]} {
    %c0 = arith.constant 0 : index
    %c0_0 = arith.constant 0 : index
    %c0_1 = arith.constant 0 : index
    %0 = vector.load %arg2[%c0, %c0_0, %c0_1] : memref<1x16x64xbf16, #tpu.memory_space<vmem>>, vector<1x16x64xbf16>
    %1 = vector.shape_cast %0 : vector<1x16x64xbf16> to vector<16x64xbf16>
    %c0_2 = arith.constant 0 : index
    %c0_3 = arith.constant 0 : index
    %2 = vector.load %arg3[%c0_2, %c0_3] : memref<16x16xbf16, #tpu.memory_space<vmem>>, vector<16x16xbf16>
    %cst = arith.constant dense<0.000000e+00> : vector<16x64xf32>
    %3 = tpu.matmul %2, %1, %cst {dimension_numbers = #tpu.dot_dimension_numbers<[1], [0], [0], [1], [0, 0, 1, 1], [], []>} : vector<16x16xbf16>, vector<16x64xbf16>, vector<16x64xf32> -> vector<16x64xf32>
    %c0_4 = arith.constant 0 : index
    %c0_5 = arith.constant 0 : index
    %4 = vector.load %arg4[%c0_4, %c0_5] : memref<16x1xf32, #tpu.memory_space<vmem>>, vector<16x1xf32>
    %5 = vector.broadcast %4 : vector<16x1xf32> to vector<16x64xf32>
    %6 = arith.addf %3, %5 : vector<16x64xf32>
    %cst_6 = arith.constant 0.000000e+00 : f32
    %7 = vector.broadcast %cst_6 : f32 to vector<16x64xf32>
    %8 = arith.maximumf %6, %7 : vector<16x64xf32>
    %9 = arith.truncf %8 : vector<16x64xf32> to vector<16x64xbf16>
    %c0_7 = arith.constant 0 : index
    %c0_8 = arith.constant 0 : index
    %10 = vector.load %arg5[%c0_7, %c0_8] : memref<16x16xbf16, #tpu.memory_space<vmem>>, vector<16x16xbf16>
    %cst_9 = arith.constant dense<0.000000e+00> : vector<16x64xf32>
    %11 = tpu.matmul %10, %9, %cst_9 {dimension_numbers = #tpu.dot_dimension_numbers<[1], [0], [0], [1], [0, 0, 1, 1], [], []>} : vector<16x16xbf16>, vector<16x64xbf16>, vector<16x64xf32> -> vector<16x64xf32>
    %c0_10 = arith.constant 0 : index
    %c0_11 = arith.constant 0 : index
    %12 = vector.load %arg6[%c0_10, %c0_11] : memref<16x1xf32, #tpu.memory_space<vmem>>, vector<16x1xf32>
    %13 = vector.broadcast %12 : vector<16x1xf32> to vector<16x64xf32>
    %14 = arith.addf %11, %13 : vector<16x64xf32>
    %cst_12 = arith.constant 0.000000e+00 : f32
    %15 = vector.broadcast %cst_12 : f32 to vector<16x64xf32>
    %16 = arith.maximumf %14, %15 : vector<16x64xf32>
    %17 = tpu.transpose %16, [1, 0] : vector<16x64xf32> -> vector<64x16xf32>
    %18 = arith.truncf %17 : vector<64x16xf32> to vector<64x16xbf16>
    %c0_13 = arith.constant 0 : index
    %c0_14 = arith.constant 0 : index
    %c0_15 = arith.constant 0 : index
    %19 = vector.load %arg9[%c0_13, %c0_14, %c0_15] : memref<1x64x16xbf16, #tpu.memory_space<vmem>>, vector<1x64x16xbf16>
    %20 = vector.shape_cast %19 : vector<1x64x16xbf16> to vector<64x16xbf16>
    %21 = vector.shape_cast %18 : vector<64x16xbf16> to vector<1x64x16xbf16>
    tpu.vector_store %arg9[%c0_13, %c0_14, %c0_15], %21 {strides = array<i32>} : memref<1x64x16xbf16, #tpu.memory_space<vmem>>, vector<1x64x16xbf16>,
    %c0_16 = arith.constant 0 : index
    %c0_17 = arith.constant 0 : index
    %22 = vector.load %arg7[%c0_16, %c0_17] : memref<16x16xbf16, #tpu.memory_space<vmem>>, vector<16x16xbf16>
    %cst_18 = arith.constant dense<0.000000e+00> : vector<16x64xf32>
    %23 = tpu.matmul %22, %1, %cst_18 {dimension_numbers = #tpu.dot_dimension_numbers<[1], [0], [0], [1], [0, 0, 1, 1], [], []>} : vector<16x16xbf16>, vector<16x64xbf16>, vector<16x64xf32> -> vector<16x64xf32>
    %c0_19 = arith.constant 0 : index
    %c0_20 = arith.constant 0 : index
    %24 = vector.load %arg8[%c0_19, %c0_20] : memref<16x1xf32, #tpu.memory_space<vmem>>, vector<16x1xf32>
    %25 = vector.broadcast %24 : vector<16x1xf32> to vector<16x64xf32>
    %26 = arith.addf %23, %25 : vector<16x64xf32>
    %27 = arith.truncf %26 : vector<16x64xf32> to vector<16x64xbf16>
    %c0_21 = arith.constant 0 : index
    %c0_22 = arith.constant 0 : index
    %c0_23 = arith.constant 0 : index
    %28 = vector.load %arg10[%c0_21, %c0_22, %c0_23] : memref<1x16x64xbf16, #tpu.memory_space<vmem>>, vector<1x16x64xbf16>
    %29 = vector.shape_cast %28 : vector<1x16x64xbf16> to vector<16x64xbf16>
    %30 = vector.shape_cast %27 : vector<16x64xbf16> to vector<1x16x64xbf16>
    tpu.vector_store %arg10[%c0_21, %c0_22, %c0_23], %30 {strides = array<i32>} : memref<1x16x64xbf16, #tpu.memory_space<vmem>>, vector<1x16x64xbf16>,
    return
  }
  func.func @transform_0(%arg0: i32, %arg1: i32) -> (i32, i32, i32) {
    %c0_i32 = arith.constant 0 : i32
    %c0_i32_0 = arith.constant 0 : i32
    return %arg0, %c0_i32, %arg1 : i32, i32, i32
  }
  func.func @transform_1(%arg0: i32, %arg1: i32) -> (i32, i32) {
    %c0_i32 = arith.constant 0 : i32
    %c0_i32_0 = arith.constant 0 : i32
    %c0_i32_1 = arith.constant 0 : i32
    return %c0_i32, %c0_i32_0 : i32, i32
  }
  func.func @transform_2(%arg0: i32, %arg1: i32) -> (i32, i32) {
    %c0_i32 = arith.constant 0 : i32
    %c0_i32_0 = arith.constant 0 : i32
    %c0_i32_1 = arith.constant 0 : i32
    return %c0_i32, %c0_i32_0 : i32, i32
  }
  func.func @transform_3(%arg0: i32, %arg1: i32) -> (i32, i32) {
    %c0_i32 = arith.constant 0 : i32
    %c0_i32_0 = arith.constant 0 : i32
    %c0_i32_1 = arith.constant 0 : i32
    return %c0_i32, %c0_i32_0 : i32, i32
  }
  func.func @transform_4(%arg0: i32, %arg1: i32) -> (i32, i32) {
    %c0_i32 = arith.constant 0 : i32
    %c0_i32_0 = arith.constant 0 : i32
    %c0_i32_1 = arith.constant 0 : i32
    return %c0_i32, %c0_i32_0 : i32, i32
  }
  func.func @transform_5(%arg0: i32, %arg1: i32) -> (i32, i32) {
    %c0_i32 = arith.constant 0 : i32
    %c0_i32_0 = arith.constant 0 : i32
    %c0_i32_1 = arith.constant 0 : i32
    return %c0_i32, %c0_i32_0 : i32, i32
  }
  func.func @transform_6(%arg0: i32, %arg1: i32) -> (i32, i32) {
    %c0_i32 = arith.constant 0 : i32
    %c0_i32_0 = arith.constant 0 : i32
    %c0_i32_1 = arith.constant 0 : i32
    return %c0_i32, %c0_i32_0 : i32, i32
  }
  func.func @transform_7(%arg0: i32, %arg1: i32) -> (i32, i32, i32) {
    %c0_i32 = arith.constant 0 : i32
    %c0_i32_0 = arith.constant 0 : i32
    return %arg0, %arg1, %c0_i32 : i32, i32, i32
  }
  func.func @transform_8(%arg0: i32, %arg1: i32) -> (i32, i32, i32) {
    %c0_i32 = arith.constant 0 : i32
    %c0_i32_0 = arith.constant 0 : i32
    return %arg0, %c0_i32, %arg1 : i32, i32, i32
  }
}

</mosaic_0001>

<bundles_post_ra>
// kernel: tpu_custom_call.1
= control target key start
LH: loop header
LB: loop body
LE: loop exit
PB: predicated region body
PF: predicated region fallthrough
CT: control target
= control target key end

     0   :  { %s1053_s0 = inlined_call_operand.vmem [shape: bf16[2,16,64], index: 0, kind: input, shape index: {}]   ;;  %s1054_s1 = inlined_call_operand.vmem [shape: bf16[16,16], index: 1, kind: input, shape index: {}]   ;;  %s1055_s2 = inlined_call_operand.vmem [shape: f32[16,1], index: 2, kind: input, shape index: {}]   ;;  %s1056_s3 = inlined_call_operand.vmem [shape: bf16[16,16], index: 3, kind: input, shape index: {}]   ;;  %s1057_s4 = inlined_call_operand.vmem [shape: f32[16,1], index: 4, kind: input, shape index: {}]   ;;  %s1058_s5 = inlined_call_operand.vmem [shape: bf16[16,16], index: 5, kind: input, shape index: {}]   ;;  %s1059_s6 = inlined_call_operand.vmem [shape: f32[16,1], index: 6, kind: input, shape index: {}]   ;;  %s1060_s7 = inlined_call_operand.vmem [shape: bf16[2,64,16], index: 7, kind: output, shape index: {0}]   ;;  %s1061_s8 = inlined_call_operand.hbm [shape: bf16[2,16,64], index: 8, kind: output, shape index: {1}]  }
   0x1   :  { %1062 = sst [smem:[#allocation5_spill]] %s1053_s0 }
   0x2   :  { %1063 = sst [smem:[#allocation6_spill]] %s1054_s1 }
   0x3   :  { %1064 = sst [smem:[#allocation7_spill]] %s1055_s2 }
   0x4   :  { %14 = vsyncpa [#allocation3], 0 }
   0x5   :  { %16 = vsyncpa [#allocation3 + $0x1], 0  ;;  %s905_s27 = smov 0   ;;  %s907_s28 = smov 0  }
   0x6   :  { %s909_s29 = smov 0   ;;  %s911_s30 = smov 0  }
   0x7   :  { %s913_s9 = smov 0   ;;  %s915_s10 = smov 0  }
   0x8 LB: > { %s675_s11 = sadd.s32 4294967295, %s855_s10   ;;  %s676_s12 = sadd.s32 4294967294, %s855_s10   ;;  %s855_s10 = sphi %s915_s10, %s22_s10   ;;  %s851_s9 = sphi %s913_s9, %s1074_s9   ;;  %s847_s30 = sphi %s911_s30, %s1073_s30   ;;  %s843_s29 = sphi %s909_s29, %s1072_s29   ;;  %s839_s28 = sphi %s907_s28, %s1071_s28   ;;  %s835_s27 = sphi %s905_s27, %s1070_s27  }
   0x9   : > { %s34_s13 = sadd.s32 1, %s851_s9  ;;  %s225_s14 = sadd.s32 1, %s843_s29 }
   0xa   : > { %p36_p0 = scmp.ge.s32.totalorder %s34_s13, 2  ;;  %p235_p1 = scmp.ne.s32.totalorder %s843_s29, %s839_s28 }
   0xb   : > { %p236_p2 = scmp.eq.s32.totalorder %s675_s11, 1  ;;  %p241_p3 = scmp.ne.s32.totalorder %s839_s28, %s835_s27 }
   0xc   : > { %s1076_s13 = smov (%p36_p0, %s34_s13), 0  ;;  %p242_p5 = scmp.eq.s32.totalorder %s676_s12, 1 }
   0xd   : > { %p945_p4 = por %p236_p2, %p235_p1  ;;  %s220_s16 = ssub.s32 %s851_s9, %s1076_s13 }
   0xe   : > { %p679_p6 = scmp.ge.s32.totalorder %s855_s10, 1  ;;  %p223_p7 = scmp.eq.s32.totalorder %s220_s16, 0 }
   0xf   : > { %p952_p8 = por %p242_p5, %p241_p3  ;;  %p289_p9 = scmp.lt.s32.totalorder %s855_s10, 3 }
  0x10   : > { %s958_s18 = scalar_select %p223_p7, %s843_s29, %s225_s14  }
  0x11   : > { %p290_p10 = pnand %p679_p6, %p289_p9 }
  0x12   : > { %s1067_s2 = sld [smem:[#allocation7_spill]] (!%p290_p10)  ;;  %p335_p11 = scmp.lt.s32.totalorder (!%p290_p10), %s847_s30, 1 }
  0x13   : > { %293 = sbr.rel (%p290_p10) target bundleno = 518 (0x206), region = 48  ;;  %s1068_s0 = sld [smem:[#allocation5_spill]] (!%p290_p10) }
  0x14   : > { %s1069_s1 = sld [smem:[#allocation6_spill]] (!%p290_p10)  ;;  %s332_s14 = sand.u32 (!%p290_p10), 1, %s839_s28  }
  0x15   : > { %s680_s16 = sshll.u32 (!%p290_p10), %s332_s14, 3  ;;  %s715_s24 = sshll.u32 (!%p290_p10), %s847_s30, 3 }
  0x16   : > { %s334_s19 = scalar_lea.vmem (!%p290_p10), [#allocation2], %s680_s16  ;;  %s556_s11 = scalar_lea.hbm (!%p290_p10), %s1061_s8, %s715_s24 }
  0x17   : > { %s557_s23 = sshll.u32 (!%p290_p10), %s334_s19, 4  ;;  %s559_s12 = sshll.u32 (!%p290_p10), %s556_s11, 4  ;;  %s558_s23 = int_to_ptr.vmem [resolvable:$true] %s557_s23  ;;  %s560_s12 = int_to_ptr.hbm [resolvable:$true] %s559_s12 }
  0x18   : > { %v358_v0 = vld [vmem:[%s1067_s2] sm:$0xff]  ;;  %v857_v1 = vmov 0   ;;  %s965_s21 = scalar_select %p335_p11, %s847_s30, 1  ;;  %v359_v5 = vld [vmem:[%s1067_s2 + $0x8] sm:$0xff]  ;;  %vm381_vm0 = vcmask 130048   ;;  %vm527_vm1 = vcmask 519168  }
  0x19   : > { %775 = vset.pattern.permute.xlu0 %v857_v1  ;;  %776 = vset.pattern.permute.xlu1 %v857_v1  ;;  %v714_v4 = vld [vmem:[%s1058_s5] sm:$0xff]  ;;  %v405_v9 = vld [vmem:[%s1057_s4 + $0x8] sm:$0xff]  ;;  %s540_s16 = scalar_lea.sflag [#allocation3], %s332_s14  ;;  %s791_s20 = sshra.s32 %s560_s12, 4  ;;  %s792_s20 = int_to_ptr.hbm [resolvable:$true] %s791_s20 }
  0x1a   : > { %362 = vperm.xlu0 %775, %v358_v0   ;;  %s709_s22 = sshll.u32 %s965_s21, 3  ;;  %v712_v3 = vld [vmem:[%s1069_s1] sm:$0xff]  ;;  %v492_v10 = vld [vmem:[%s1059_s6 + $0x8] sm:$0xff]  ;;  %s797_s30 = scalar_lea.hbm %s1061_s8, 16 }
  0x1b   : > { %s342_s25 = scalar_lea.vmem %s1068_s0, %s709_s22  ;;  %v491_v6 = vld [vmem:[%s1059_s6] sm:$0xff]  ;;  %s793_s22 = scalar_lea.hbm %s792_s20, 8 }
  0x1c   : > { %v711_v2 = vld [vmem:[%s342_s25] sm:$0xff]  ;;  %p794_p12 = scmp.ne.s32.totalorder %s792_s20, %s793_s22  ;;  %p798_p1 = scmp.lt.s32.totalorder %s792_s20, %s1061_s8 }
  0x1d   : > { %392 = vmatpush.bf16.msra.mxu0 %v711_v2  ;;  %518 = vmatpush.bf16.msra.mxu2 %v711_v2  ;;  %v404_v7 = vld [vmem:[%s1057_s4] sm:$0xff]  ;;  %p799_p2 = scmp.lt.s32.totalorder %s797_s30, %s793_s22 }
  0x1e   : > { %408 = vperm.xlu1 %776, %v404_v7   ;;  %v713_v23 = vld [vmem:[%s1056_s3] sm:$0xff]  ;;  %p795_p13 = pnand %p794_p12, %p945_p4 }
  0x1f   : > { %p800_p3 = por %p799_p2, %p798_p1 }
  0x20   : > { %693 = vmatmul.msk.bf16.vlgmr.msra.gmra.mxu0 %vm381_vm0, %v712_v3  ;;  %703 = vmatmul.msk.bf16.vlgmr.msra.gmra.mxu2 %vm381_vm0, %v714_v4  ;;  %p796_p0 = pneg %p795_p13 }
  0x22   : > { %367 = vperm.xlu0 %775, %v359_v5   ;;  %p801_p5 = pnand %p800_p3, %p796_p0 }
  0x26   : > { %413 = vperm.xlu1 %776, %v405_v9  }
  0x2a   : > { %495 = vperm.xlu0 %775, %v491_v6  }
  0x2e   : > { %500 = vperm.xlu1 %776, %v492_v10  }
  0x8c   : > { %v363_v8 = vpop.permute.xlu0 %362 }
  0x90   : > { %v409_v24 = vpop.permute.xlu1 %408 }
  0x94   : > { %v368_v11 = vpop.permute.xlu0 %367 }
  0x98   : > { %v414_v25 = vpop.permute.xlu1 %413 }
  0x9c   : > { %v496_v13 = vpop.permute.xlu0 %495 }
  0x9d   : > { %v394_v12 = vpop.f32.mrf.mxu0 }
  0x9e   : > { %v395_v15 = vadd.f32 %v394_v12, %v363_v8 }
  0xa0   : > { %v399_v20 = vmax.f32 %v395_v15, 0.0  ;;  %v501_v26 = vpop.permute.xlu1 %500 }
  0xa3   : > { %v520_v14 = vpop.f32.mrf.mxu2 }
  0xa4   : > { %v521_v16 = vadd.f32 %v520_v14, %v496_v13 }
  0xa5   : > { %v396_v17 = vpop.f32.mrf.mxu0 }
  0xa6   : > { %v525_v18 = vpack.c.bf16 %v521_v16, %v521_v16  ;;  %v397_v19 = vadd.f32 %v396_v17, %v368_v11 }
  0xa8   : > { %528 = vst.msk [vmem:[%s334_s19] sm:$0xf] %vm527_vm1, %v525_v18  ;;  %v400_v21 = vmax.f32 %v397_v19, 0.0 }
  0xaa   : > { %v401_v22 = vpack.c.bf16 %v400_v21, %v399_v20 }
  0xab   : > { %v522_v27 = vpop.f32.mrf.mxu2 }
  0xac   : > { %431 = vmatpush.bf16.msra.mxu1 %v401_v22  ;;  %v523_v28 = vadd.f32 %v522_v27, %v501_v26 }
  0xae   : > { %v526_v29 = vpack.c.bf16 %v523_v28, %v523_v28 }
  0xaf   : > { %698 = vmatmul.msk.bf16.vlgmr.msra.gmra.mxu1 %vm381_vm0, %v713_v23 }
  0xb0   : > { %529 = vst.msk [vmem:[%s334_s19 + $0x4] sm:$0xf] %vm527_vm1, %v526_v29 }
 0x12c   : > { %v433_v30 = vpop.f32.mrf.mxu1 }
 0x12d   : > { %v434_v31 = vadd.f32 %v433_v30, %v409_v24 }
 0x12f   : > { %v438_v32 = vmax.f32 %v434_v31, 0.0 }
 0x131   : > { %440 = vxpose.xlu2.b32.start [1/2] (short) (narrow) %v438_v32, 64 }
 0x134   : > { %v435_v33 = vpop.f32.mrf.mxu1 }
 0x135   : > { %v436_v34 = vadd.f32 %v435_v33, %v414_v25 }
 0x137   : > { %v439_v35 = vmax.f32 %v436_v34, 0.0 }
 0x139   : > { %441 = vxpose.xlu2.b32.end [2/2] (short) (narrow) %v439_v35, 64 }
 0x13a   : > { %804 = shalt.err (!%p801_p5)
}
 0x13b   : > { %s858_s14 = smov 64   ;;  %s859_s24 = smov 4   ;;  %vm480_vm2 = vcmask 125952  }
 0x13c   : > { %716 = dma.vmem_to_hbm [thread:$0]  (%p945_p4), %s558_s23, 128, %s560_s12, %s540_s16, %s858_s14, %s858_s14, %s859_s24  }
 0x13d   : > { %s710_s25 = sshll.u32 %s965_s21, 5 }
 0x13e   : > { %s351_s0 = scalar_lea.vmem %s1060_s7, %s710_s25 }
 0x1ca   : > { %v456_v36 = vpop.trf.xlu2 }
 0x1cb   : > { %v472_v37 = vpack.c.bf16 %v456_v36, %v456_v36 }
 0x1cd   : > { %481 = vst.msk [vmem:[%s351_s0] sm:$0xf] %vm480_vm2, %v472_v37 }
 0x1d2   : > { %v457_v38 = vpop.trf.xlu2 }
 0x1d3   : > { %v473_v39 = vpack.c.bf16 %v457_v38, %v457_v38 }
 0x1d5   : > { %482 = vst.msk [vmem:[%s351_s0 + $0x4] sm:$0xf] %vm480_vm2, %v473_v39 }
 0x1da   : > { %v458_v40 = vpop.trf.xlu2 }
 0x1db   : > { %v474_v41 = vpack.c.bf16 %v458_v40, %v458_v40 }
 0x1dd   : > { %483 = vst.msk [vmem:[%s351_s0 + $0x8] sm:$0xf] %vm480_vm2, %v474_v41 }
 0x1e2   : > { %v459_v42 = vpop.trf.xlu2 }
 0x1e3   : > { %v475_v43 = vpack.c.bf16 %v459_v42, %v459_v42 }
 0x1e5   : > { %484 = vst.msk [vmem:[%s351_s0 + $0xc] sm:$0xf] %vm480_vm2, %v475_v43 }
 0x1ea   : > { %v460_v44 = vpop.trf.xlu2 }
 0x1eb   : > { %v476_v45 = vpack.c.bf16 %v460_v44, %v460_v44 }
 0x1ed   : > { %485 = vst.msk [vmem:[%s351_s0 + $0x10] sm:$0xf] %vm480_vm2, %v476_v45 }
 0x1f2   : > { %v461_v46 = vpop.trf.xlu2 }
 0x1f3   : > { %v477_v47 = vpack.c.bf16 %v461_v46, %v461_v46 }
 0x1f5   : > { %486 = vst.msk [vmem:[%s351_s0 + $0x14] sm:$0xf] %vm480_vm2, %v477_v47 }
 0x1fa   : > { %v462_v48 = vpop.trf.xlu2 }
 0x1fb   : > { %v478_v49 = vpack.c.bf16 %v462_v48, %v462_v48 }
 0x1fd   : > { %487 = vst.msk [vmem:[%s351_s0 + $0x18] sm:$0xf] %vm480_vm2, %v478_v49 }
 0x202   : > { %v463_v50 = vpop.trf.xlu2 }
 0x203   : > { %v479_v51 = vpack.c.bf16 %v463_v50, %v463_v50 }
 0x205   : > { %488 = vst.msk [vmem:[%s351_s0 + $0x1c] sm:$0xf] %vm480_vm2, %v479_v51 }
 0x206 PF: > { %p722_p4 = scmp.ge.s32.totalorder %s855_s10, 2  ;;  %s586_s1 = sand.u32 1, %s835_s27  }
 0x207   : > { %s587_s2 = scalar_lea.sflag [#allocation3], %s586_s1 }
 0x208   : > { %p719_p6 = pnand %p722_p4, %p952_p8 }
 0x20a   : > { %p720_p7 = pneg %p719_p6 }
 0x20c   : > { %830 = dma.done.wait (%p720_p7), %s587_s2, 128  }
 0x20d   : > { %832 = vsyncadd (%p720_p7), %s587_s2, 4294967168  ;;  %s22_s10 = sadd.s32 1, %s855_s10   ;;  %s1070_s27 = smov %s839_s28 }
 0x20e   : > { %p19_p9 = scmp.ge.s32.totalorder %s22_s10, 4   ;;  %s1071_s28 = smov %s843_s29 }
 0x20f   : > { %s1072_s29 = smov %s958_s18  ;;  %s1073_s30 = smov %s851_s9 }
 0x210   : > { %s1074_s9 = smov %s1076_s13  ;;  %21 = sbr.rel (!%p19_p9) target bundleno = 8 (0x8), region = 95 }
 0x215   :  { %593 = vsyncpa [#allocation3], 1 }
 0x216   :  { %595 = vsyncpa [#allocation3 + $0x1], 1 }

</bundles_post_ra>
